<compile_context>
chip_gen: v7x
topology: tpu7x:2x2x1
jax: 0.10.0
libtpu: 0.0.40
codegen_flags: <defaults>
</compile_context>

<pallas_src>
import jax
import jax.numpy as jnp
from jax.experimental import pallas as pl
from jax.experimental.pallas import tpu as pltpu

SEQ = 256        # rows (lane-dense, multiple of TM)
HIDDEN = 512     # features (multiple of 128 -> no masked stores)
TM, TN, TK = 128, 128, 256   # per-step tiles; fills the MXU, tiny VMEM footprint


def residual_linear_kernel(x_ref, w_ref, b_ref, r_ref, o_ref, acc_ref):
    """One (i, j, k) grid step of  out = x @ W + b + x."""
    k = pl.program_id(2)

    @pl.when(k == 0)
    def _init():
        acc_ref[...] = jnp.zeros_like(acc_ref)

    # bf16 x bf16 -> f32 accumulate on the MXU.
    acc_ref[...] += jnp.dot(x_ref[...], w_ref[...],
                            preferred_element_type=jnp.float32)

    # Bias + residual + downcast happen once per output tile, not per k-step.
    @pl.when(k == pl.num_programs(2) - 1)
    def _finalize():
        y = acc_ref[...] + b_ref[...] + r_ref[...]
        o_ref[...] = y.astype(o_ref.dtype)


def residual_add_linear(x, w, b, *, tm=TM, tn=TN, tk=TK):
    seq, hidden = x.shape
    assert w.shape == (hidden, hidden), "Linear is hidden -> hidden"
    assert b.shape == (1, hidden)
    assert seq % tm == 0 and hidden % tn == 0 and hidden % tk == 0, (
        "demo requires tile-divisible shapes; pad in the caller otherwise")

    # bf16 operands for the matmul (halves W traffic, full MXU rate on
    # v6e/v7x); residual and bias stay f32 and are added in f32.
    x_mm = x.astype(jnp.bfloat16)
    w_mm = w.astype(jnp.bfloat16)

    grid = (seq // tm, hidden // tn, hidden // tk)

    return pl.pallas_call(
        residual_linear_kernel,
        out_shape=jax.ShapeDtypeStruct((seq, hidden), x.dtype),
        grid_spec=pltpu.PrefetchScalarGridSpec(
            num_scalar_prefetch=0,
            grid=grid,
            in_specs=[
                pl.BlockSpec((tm, tk), lambda i, j, k: (i, k)),   # x (LHS)
                pl.BlockSpec((tk, tn), lambda i, j, k: (k, j)),   # W
                pl.BlockSpec((1, tn), lambda i, j, k: (0, j)),    # bias (N-indexed only)
                pl.BlockSpec((tm, tn), lambda i, j, k: (i, j)),   # residual x tile
            ],
            out_specs=pl.BlockSpec((tm, tn), lambda i, j, k: (i, j)),
            scratch_shapes=[pltpu.VMEM((tm, tn), jnp.float32)],   # f32 accumulator
        ),
        compiler_params=pltpu.CompilerParams(
            # v7x: seq / output-N shard across the 2 TensorCores; reduction
            # axis last and "arbitrary" so the accumulator stays resident.
            dimension_semantics=("parallel", "parallel", "arbitrary")),
        # Per-step VMEM: (2x dbl-buffered) x/W/bias/residual tiles + f32 acc
        # ~= 1.3 MiB, comfortably inside the 32 MiB scoped default on all of
        # v5e / v6e / v7x, so no explicit vmem_limit_bytes needed here.
    )(x_mm, w_mm, b, x)


if __name__ == "__main__":
    key = jax.random.PRNGKey(0)
    kx, kw, kb = jax.random.split(key, 3)

    x = jax.random.normal(kx, (SEQ, HIDDEN), dtype=jnp.float32)
    # Deterministic synthetic "Linear" parameters (not a checkpoint).
    w = jax.random.normal(kw, (HIDDEN, HIDDEN), dtype=jnp.float32) * 0.02
    b = jax.random.normal(kb, (1, HIDDEN), dtype=jnp.float32) * 0.01

    out = residual_add_linear(x, w, b)
    jax.block_until_ready(out)

    # Reference: module(x) + x with the same bf16-operand / f32-accumulate
    # matmul the kernel performs.
    ref = (jnp.dot(x.astype(jnp.bfloat16), w.astype(jnp.bfloat16),
                   preferred_element_type=jnp.float32) + b + x)
    assert out.shape == (SEQ, HIDDEN) and out.dtype == x.dtype
    assert jnp.allclose(out, ref, atol=1e-3, rtol=1e-3), "mismatch vs reference"

    print("KERNEL_OK")
</pallas_src>

<mosaic_0001>
module attributes {stable_mosaic.version = 11 : i64} {
  func.func @residual_linear_kernel(%arg0: i32, %arg1: i32, %arg2: i32, %arg3: memref<128x256xbf16, #tpu.memory_space<vmem>>, %arg4: memref<256x128xbf16, #tpu.memory_space<vmem>>, %arg5: memref<1x128xf32, #tpu.memory_space<vmem>>, %arg6: memref<128x128xf32, #tpu.memory_space<vmem>>, %arg7: memref<128x128xf32, #tpu.memory_space<vmem>>, %arg8: memref<128x128xf32, #tpu.memory_space<vmem>>) attributes {dimension_semantics = [#tpu.dimension_semantics<parallel>, #tpu.dimension_semantics<parallel>, #tpu.dimension_semantics<arbitrary>], iteration_bounds = array<i64: 2, 4, 2>, scalar_prefetch = 0 : i64, scratch_operands = 1 : i64, tpu.core_type = #tpu.core_type<tc>, window_params = [{transform_indices = @transform_0, window_bounds = array<i64: 128, 256>}, {transform_indices = @transform_1, window_bounds = array<i64: 256, 128>}, {transform_indices = @transform_2, window_bounds = array<i64: 1, 128>}, {transform_indices = @transform_3, window_bounds = array<i64: 128, 128>}, {transform_indices = @transform_4, window_bounds = array<i64: 128, 128>}]} {
    %c0_i32 = arith.constant 0 : i32
    %0 = arith.cmpi eq, %arg2, %c0_i32 : i32
    %1 = arith.extui %0 : i1 to i32
    %c0_i32_0 = arith.constant 0 : i32
    %2 = arith.cmpi ne, %1, %c0_i32_0 : i32
    scf.if %2 {
      %cst_9 = arith.constant 0.000000e+00 : f32
      %12 = vector.broadcast %cst_9 : f32 to vector<128x128xf32>
      %c0_10 = arith.constant 0 : index
      %c0_11 = arith.constant 0 : index
      %13 = vector.load %arg8[%c0_10, %c0_11] : memref<128x128xf32, #tpu.memory_space<vmem>>, vector<128x128xf32>
      tpu.vector_store %arg8[%c0_10, %c0_11], %12 {strides = array<i32>} : memref<128x128xf32, #tpu.memory_space<vmem>>, vector<128x128xf32>,
    } else {
    }
    %c0 = arith.constant 0 : index
    %c0_1 = arith.constant 0 : index
    %3 = vector.load %arg8[%c0, %c0_1] : memref<128x128xf32, #tpu.memory_space<vmem>>, vector<128x128xf32>
    %c0_2 = arith.constant 0 : index
    %c0_3 = arith.constant 0 : index
    %4 = vector.load %arg3[%c0_2, %c0_3] : memref<128x256xbf16, #tpu.memory_space<vmem>>, vector<128x256xbf16>
    %c0_4 = arith.constant 0 : index
    %c0_5 = arith.constant 0 : index
    %5 = vector.load %arg4[%c0_4, %c0_5] : memref<256x128xbf16, #tpu.memory_space<vmem>>, vector<256x128xbf16>
    %cst = arith.constant dense<0.000000e+00> : vector<128x128xf32>
    %6 = tpu.matmul %4, %5, %cst {dimension_numbers = #tpu.dot_dimension_numbers<[1], [0], [0], [1], [0, 0, 1, 1], [], []>} : vector<128x256xbf16>, vector<256x128xbf16>, vector<128x128xf32> -> vector<128x128xf32>
    %7 = arith.addf %3, %6 : vector<128x128xf32>
    %c0_6 = arith.constant 0 : index
    %c0_7 = arith.constant 0 : index
    %8 = vector.load %arg8[%c0_6, %c0_7] : memref<128x128xf32, #tpu.memory_space<vmem>>, vector<128x128xf32>
    tpu.vector_store %arg8[%c0_6, %c0_7], %7 {strides = array<i32>} : memref<128x128xf32, #tpu.memory_space<vmem>>, vector<128x128xf32>,
    %c1_i32 = arith.constant 1 : i32
    %9 = arith.cmpi eq, %arg2, %c1_i32 : i32
    %10 = arith.extui %9 : i1 to i32
    %c0_i32_8 = arith.constant 0 : i32
    %11 = arith.cmpi ne, %10, %c0_i32_8 : i32
    scf.if %11 {
      %c0_9 = arith.constant 0 : index
      %c0_10 = arith.constant 0 : index
      %12 = vector.load %arg8[%c0_9, %c0_10] : memref<128x128xf32, #tpu.memory_space<vmem>>, vector<128x128xf32>
      %c0_11 = arith.constant 0 : index
      %c0_12 = arith.constant 0 : index
      %13 = vector.load %arg5[%c0_11, %c0_12] : memref<1x128xf32, #tpu.memory_space<vmem>>, vector<1x128xf32>
      %14 = vector.broadcast %13 : vector<1x128xf32> to vector<128x128xf32>
      %15 = arith.addf %12, %14 : vector<128x128xf32>
      %c0_13 = arith.constant 0 : index
      %c0_14 = arith.constant 0 : index
      %16 = vector.load %arg6[%c0_13, %c0_14] : memref<128x128xf32, #tpu.memory_space<vmem>>, vector<128x128xf32>
      %17 = arith.addf %15, %16 : vector<128x128xf32>
      %c0_15 = arith.constant 0 : index
      %c0_16 = arith.constant 0 : index
      %18 = vector.load %arg7[%c0_15, %c0_16] : memref<128x128xf32, #tpu.memory_space<vmem>>, vector<128x128xf32>
      tpu.vector_store %arg7[%c0_15, %c0_16], %17 {strides = array<i32>} : memref<128x128xf32, #tpu.memory_space<vmem>>, vector<128x128xf32>,
    } else {
    }
    return
  }
  func.func @transform_0(%arg0: i32, %arg1: i32, %arg2: i32) -> (i32, i32) {
    %c0_i32 = arith.constant 0 : i32
    return %arg0, %arg2 : i32, i32
  }
  func.func @transform_1(%arg0: i32, %arg1: i32, %arg2: i32) -> (i32, i32) {
    %c0_i32 = arith.constant 0 : i32
    return %arg2, %arg1 : i32, i32
  }
  func.func @transform_2(%arg0: i32, %arg1: i32, %arg2: i32) -> (i32, i32) {
    %c0_i32 = arith.constant 0 : i32
    %c0_i32_0 = arith.constant 0 : i32
    return %c0_i32, %arg1 : i32, i32
  }
  func.func @transform_3(%arg0: i32, %arg1: i32, %arg2: i32) -> (i32, i32) {
    %c0_i32 = arith.constant 0 : i32
    return %arg0, %arg1 : i32, i32
  }
  func.func @transform_4(%arg0: i32, %arg1: i32, %arg2: i32) -> (i32, i32) {
    %c0_i32 = arith.constant 0 : i32
    return %arg0, %arg1 : i32, i32
  }
}

</mosaic_0001>

<bundles_post_ra>
// kernel: tpu_custom_call.1
= control target key start
LH: loop header
LB: loop body
LE: loop exit
PB: predicated region body
PF: predicated region fallthrough
CT: control target
= control target key end

     0   :  { %s2205_s0 = inlined_call_operand.hbm [shape: bf16[256,512], index: 0, kind: input, shape index: {}]   ;;  %s2206_s1 = inlined_call_operand.hbm [shape: bf16[512,512], index: 1, kind: input, shape index: {}]   ;;  %s2207_s2 = inlined_call_operand.vmem [shape: f32[1,512], index: 2, kind: input, shape index: {}]   ;;  %s2208_s3 = inlined_call_operand.hbm [shape: f32[256,512], index: 3, kind: input, shape index: {}]   ;;  %s2209_s4 = inlined_call_operand.hbm [shape: f32[256,512], index: 4, kind: output, shape index: {}]  }
   0x1   :  { %2228 = sst [smem:[#allocation25_spill]] %s2205_s0 }
   0x2   :  { %2229 = sst [smem:[#allocation26_spill]] %s2206_s1 }
   0x3   :  { %2230 = sst [smem:[#allocation27_spill]] %s2207_s2 }
   0x4   :  { %2231 = sst [smem:[#allocation28_spill]] %s2208_s3 }
   0x5   :  { %2232 = sst [smem:[#allocation29_spill]] %s2209_s4 }
   0x6   :  { %9 = vsyncpa [#allocation4], 0 }
   0x7   :  { %11 = vsyncpa [#allocation4 + $0x1], 0 }
   0x8   :  { %12 = vsyncpa [#allocation7], 0 }
   0x9   :  { %14 = vsyncpa [#allocation7 + $0x1], 0 }
   0xa   :  { %15 = vsyncpa [#allocation5], 0 }
   0xb   :  { %17 = vsyncpa [#allocation5 + $0x1], 0  ;;  %s1644_s15 = smov 0   ;;  %s1646_s16 = smov 0  }
   0xc   :  { %s1648_s17 = smov 0   ;;  %s1650_s18 = smov 0  }
   0xd   :  { %s1652_s19 = smov 0   ;;  %s1654_s20 = smov 0  }
   0xe   :  { %s1656_s21 = smov 0   ;;  %s1658_s22 = smov 0  }
   0xf   :  { %s1660_s23 = smov 0   ;;  %s1662_s24 = smov 0  }
  0x10   :  { %s1664_s25 = smov 0   ;;  %s1666_s26 = smov 0  }
  0x11   :  { %s1668_s27 = smov 0   ;;  %s1670_s28 = smov 0  }
  0x12   :  { %s1672_s29 = smov 0   ;;  %s1674_s30 = smov 0  }
  0x13 LB: > { %2233 = sst [smem:[#allocation14_spill]] %s1543_s15  ;;  %s1723_s5 = sadd.s32 4294967295, %s1603_s30   ;;  %s1603_s30 = sphi %s1674_s30, %s23_s30   ;;  %s1599_s29 = sphi %s1672_s29, %s2306_s29   ;;  %s1595_s28 = sphi %s1670_s28, %s2305_s28   ;;  %s1591_s27 = sphi %s1668_s27, %s2304_s27   ;;  %s1587_s26 = sphi %s1666_s26, %s2303_s26   ;;  %s1583_s25 = sphi %s1664_s25, %s2302_s25   ;;  %s1579_s24 = sphi %s1662_s24, %s2301_s24   ;;  %s1575_s23 = sphi %s1660_s23, %s2300_s23   ;;  %s1571_s22 = sphi %s1658_s22, %s2299_s22   ;;  %s1567_s21 = sphi %s1656_s21, %s2298_s21   ;;  %s1563_s20 = sphi %s1654_s20, %s2290_s20   ;;  %s1559_s19 = sphi %s1652_s19, %s2289_s19   ;;  %s1555_s18 = sphi %s1650_s18, %s2288_s18   ;;  %s1551_s17 = sphi %s1648_s17, %s2297_s17   ;;  %s1547_s16 = sphi %s1646_s16, %s2296_s16   ;;  %s1543_s15 = sphi %s1644_s15, %s2295_s15  }
  0x14   : > { %2234 = sst [smem:[#allocation15_spill]] %s1559_s19  ;;  %s35_s6 = sadd.s32 1, %s1591_s27 }
  0x15   : > { %2235 = sst [smem:[#allocation16_spill]] %s1563_s20  ;;  %p36_p0 = scmp.ge.s32.totalorder %s35_s6, 2 }
  0x16   : > { %2236 = sst [smem:[#allocation17_spill]] %s1579_s24  ;;  %s38_s7 = sadd.s32 1, %s1595_s28 }
  0x17   : > { %2237 = sst [smem:[#allocation18_spill]] %s1583_s25  ;;  %p2220_p1 = scmp.eq.s32.totalorder %s1603_s30, 0 }
  0x18   : > { %2238 = sst [smem:[#allocation19_spill]] %s1587_s26  ;;  %p2219_p2 = scmp.eq.s32.totalorder %s1723_s5, 0 }
  0x19   : > { %s2308_s6 = smov (%p36_p0, %s35_s6), 0  ;;  %s2310_s7 = smov (!%p36_p0, %s38_s7), %s1595_s28 }
  0x1a   : > { %2239 = sst [smem:[#allocation20_spill]] %s2308_s6  ;;  %s1736_s8 = ssub.s32 %s1591_s27, %s2308_s6 }
  0x1b   : > { %s79_s9 = sadd.s32 1, %s1563_s20  ;;  %p2221_p3 = scmp.ge.s32.totalorder %s2310_s7, 4 }
  0x1c   : > { %p86_p4 = scmp.ne.s32.totalorder %s1563_s20, %s1559_s19  ;;  %p92_p5 = scmp.ne.s32.totalorder %s1559_s19, %s1555_s18 }
  0x1d   : > { %s1746_s10 = scalar_select %p2221_p3, 0, %s2310_s7  }
  0x1e   : > { %p1750_p6 = por %p86_p4, %p2220_p1  ;;  %p1756_p7 = por %p92_p5, %p2219_p2 }
  0x1f   : > { %2240 = sst [smem:[#allocation21_spill]] %s1746_s10  ;;  %s1762_s13 = ssub.s32 %s1595_s28, %s1746_s10 }
  0x20   : > { %s2242_s12 = scalar_select %p1756_p7, 1, 0 }
  0x21   : > { %p2218_p8 = scmp.lt.s32.totalorder %s1603_s30, 16  ;;  %s76_s14 = sor.u32 %s1762_s13, %s1736_s8 }
  0x22   : > { %2243 = sst [smem:[#allocation22_spill]] %s2242_s12  ;;  %p77_p9 = scmp.eq.s32.totalorder %s76_s14, 0 }
  0x23   : > { %s222_s18 = sand.u32 1, %s1603_s30   ;;  %s224_s6 = sand.u32 1, %s1563_s20  }
  0x24   : > { %s1770_s4 = scalar_select %p77_p9, %s1563_s20, %s79_s9  }
  0x25   : > { %s1003_s26 = sshll.u32 %s224_s6, 7  ;;  %s1058_s24 = sshll.u32 %s1591_s27, 7 }
  0x26   : > { %2244 = sst [smem:[#allocation23_spill]] %s1770_s4  ;;  %s232_s2 = sadd.s32 %s1595_s28, %s1058_s24 }
  0x27   : > { %s1006_s25 = sshll.u32 %s232_s2, 6  ;;  %s226_s19 = scalar_lea.vmem [#allocation6], %s1003_s26 }
  0x28   : > { %s235_s12 = sshll.u32 %s226_s19, 4  ;;  %s2245_s1 = sld [smem:[#allocation26_spill]]  ;;  %s1779_s12 = int_to_ptr.vmem [resolvable:$true] %s235_s12 }
  0x29   : > { %p1785_p10 = pnand %p2218_p8, %p1750_p6  ;;  %s1791_s2 = scalar_lea.sflag [#allocation7], %s222_s18 }
  0x2b   : > { %p1345_p0 = pneg %p1785_p10 }
  0x2e   : > { %s1777_s10 = scalar_lea.hbm %s2245_s1, %s1006_s25  ;;  %s1348_s24 = scalar_lea.hbm %s2245_s1, 16384 }
  0x2f   : > { %s1343_s3 = scalar_lea.hbm %s1777_s10, 2048  ;;  %p1349_p6 = scmp.lt.u32.totalorder %s1777_s10, %s2245_s1 }
  0x30   : > { %p1344_p13 = scmp.ne.s32.totalorder %s1777_s10, %s1343_s3  ;;  %p1350_p9 = scmp.lt.u32.totalorder %s1348_s24, %s1343_s3 }
  0x31   : > { %p1352_p2 = scmp.lt.u32.totalorder %s1343_s3, %s1777_s10 }
  0x32   : > { %p1346_p4 = pnand %p1345_p0, %p1344_p13  ;;  %p1351_p8 = por %p1350_p9, %p1349_p6 }
  0x34   : > { %p1347_p5 = pneg %p1346_p4  ;;  %p1353_p1 = por %p1352_p2, %p1351_p8 }
  0x36   : > { %p1354_p3 = pnand %p1353_p1, %p1347_p5 }
  0x38   : > { %1357 = shalt.err (!%p1354_p3)
}
  0x39   : > { %s1358_s9 = scalar_lea.vmem %s1779_s12, 2048  ;;  %s1605_s11 = smov [#allocation6]  }
  0x3a   : > { %p1359_p13 = scmp.ne.s32.totalorder %s1779_s12, %s1358_s9  ;;  %s1363_s14 = sshll.u32 %s1605_s11, 4  ;;  %s1364_s14 = int_to_ptr.vmem [resolvable:$false] %s1363_s14 }
  0x3b   : > { %s1365_s18 = scalar_lea.vmem %s1364_s14, 4096  ;;  %p1366_p12 = scmp.lt.s32.totalorder %s1779_s12, %s1364_s14 }
  0x3c   : > { %p1361_p4 = pnand %p1359_p13, %p1345_p0  ;;  %p1367_p6 = scmp.lt.s32.totalorder %s1365_s18, %s1358_s9 }
  0x3e   : > { %p1362_p11 = pneg %p1361_p4  ;;  %p1368_p9 = por %p1367_p6, %p1366_p12 }
  0x40   : > { %p1369_p2 = pnand %p1368_p9, %p1362_p11 }
  0x42   : > { %1372 = shalt.err (!%p1369_p2)
}
  0x43   : > { %s2222_s3 = smov 256   ;;  %s1607_s15 = smov 64  }
  0x44   : > { %s1608_s19 = smov 4   ;;  %p2247_p1 = scmp.lt.s32.totalorder %s1603_s30, 17 }
  0x45   : > { %1155 = dma.hbm_to_vmem [thread:$0]  (!%p1785_p10), %s1777_s10, 2048, %s1779_s12, %s1791_s2, %s2222_s3, %s1607_s15, %s1608_s19  }
  0x46   : > { %p2248_p3 = scmp.ge.s32.totalorder %s1603_s30, 1  ;;  %s42_s25 = sadd.s32 1, %s1599_s29 }
  0x47   : > { %p2250_p11 = scmp.ge.s32.totalorder %s2310_s7, 4  ;;  %s51_s26 = sadd.s32 1, %s1575_s23 }
  0x48   : > { %p1824_p8 = pnand %p2248_p3, %p2247_p1  ;;  %p58_p12 = scmp.ne.s32.totalorder %s1575_s23, %s1571_s22 }
  0x49   : > { %s2312_s25 = smov (!%p2250_p11, %s42_s25), %s1599_s29  ;;  %p64_p5 = scmp.ne.s32.totalorder %s1571_s22, %s1567_s21 }
  0x4a   : > { %s2249_s24 = scalar_select %p1824_p8, 1, 0 }
  0x4b   : > { %p44_p0 = scmp.ge.s32.totalorder %s2312_s25, 2  ;;  %p2251_p13 = scmp.eq.s32.totalorder %s1603_s30, 0 }
  0x4c   : > { %s198_s12 = sand.u32 1, %s1575_s23   ;;  %p2254_p10 = scmp.eq.s32.totalorder %s1723_s5, 0 }
  0x4d   : > { %p1839_p4 = por %p2251_p13, %p58_p12  ;;  %s2314_s25 = smov (%p44_p0, %s2312_s25), 0 }
  0x4e   : > { %2253 = sst [smem:[#allocation24_spill]] %s2314_s25  ;;  %p1848_p6 = por %p2254_p10, %p64_p5 }
  0x4f   : > { %s46_s6 = ssub.s32 %s1599_s29, %s2314_s25  ;;  %s998_s9 = sshll.u32 %s198_s12, 7 }
  0x50   : > { %s2255_s7 = scalar_select %p1848_p6, 1, 0 }
  0x51   : > { %s48_s21 = sor.u32 %s1736_s8, %s46_s6  ;;  %s130_s11 = sor.u32 %s1762_s13, %s46_s6 }
  0x52   : > { %p49_p9 = scmp.eq.s32.totalorder %s48_s21, 0  ;;  %p1856_p2 = scmp.eq.s32.totalorder %s130_s11, 0 }
  0x53   : > { %s1000_s18 = sshll.u32 %s1591_s27, 1  ;;  %s1057_s19 = sshll.u32 %s1599_s29, 6 }
  0x54   : > { %s1862_s15 = scalar_select %p49_p9, %s1575_s23, %s51_s26  }
  0x55   : > { %s202_s3 = scalar_lea.vmem [#allocation3], %s998_s9  ;;  %s209_s4 = sadd.s32 %s1057_s19, %s1000_s18 }
  0x56   : > { %s212_s1 = sshll.u32 %s202_s3, 4  ;;  %s1002_s20 = sshll.u32 %s209_s4, 6  ;;  %s1867_s1 = int_to_ptr.vmem [resolvable:$true] %s212_s1 }
  0x57   : > { %p2257_p1 = scmp.lt.s32.totalorder %s1603_s30, 16  ;;  %s2259_s0 = sld [smem:[#allocation25_spill]] }
  0x58   : > { %s1882_s3 = scalar_lea.sflag [#allocation4], %s198_s12 }
  0x59   : > { %p1873_p3 = pnand %p2257_p1, %p1839_p4 }
  0x5b   : > { %p1375_p12 = pneg %p1873_p3 }
  0x5d   : > { %s1880_s26 = scalar_lea.hbm %s2259_s0, %s1002_s20  ;;  %s1378_s21 = scalar_lea.hbm %s2259_s0, 8192 }
  0x5e   : > { %s1373_s4 = scalar_lea.hbm %s1880_s26, 2048  ;;  %p1379_p13 = scmp.lt.u32.totalorder %s1880_s26, %s2259_s0 }
  0x5f   : > { %p1374_p11 = scmp.ne.s32.totalorder %s1880_s26, %s1373_s4  ;;  %p1380_p4 = scmp.lt.u32.totalorder %s1378_s21, %s1373_s4 }
  0x60   : > { %p1382_p9 = scmp.lt.u32.totalorder %s1373_s4, %s1880_s26 }
  0x61   : > { %p1376_p0 = pnand %p1375_p12, %p1374_p11  ;;  %p1381_p10 = por %p1380_p4, %p1379_p13 }
  0x63   : > { %p1377_p5 = pneg %p1376_p0  ;;  %p1383_p1 = por %p1382_p9, %p1381_p10 }
  0x65   : > { %p1384_p7 = pnand %p1383_p1, %p1377_p5 }
  0x67   : > { %1387 = shalt.err (!%p1384_p7)
}
  0x68   : > { %s1388_s12 = scalar_lea.vmem %s1867_s1, 2048  ;;  %s1609_s18 = smov [#allocation3]  }
  0x69   : > { %p1389_p11 = scmp.ne.s32.totalorder %s1867_s1, %s1388_s12  ;;  %s1393_s13 = sshll.u32 %s1609_s18, 4  ;;  %s1394_s13 = int_to_ptr.vmem [resolvable:$false] %s1393_s13 }
  0x6a   : > { %s1395_s6 = scalar_lea.vmem %s1394_s13, 4096  ;;  %p1396_p8 = scmp.lt.s32.totalorder %s1867_s1, %s1394_s13 }
  0x6b   : > { %p1391_p0 = pnand %p1389_p11, %p1375_p12  ;;  %p1397_p13 = scmp.lt.s32.totalorder %s1395_s6, %s1388_s12 }
  0x6d   : > { %p1392_p6 = pneg %p1391_p0  ;;  %p1398_p4 = por %p1397_p13, %p1396_p8 }
  0x6f   : > { %p1399_p10 = pnand %p1398_p4, %p1392_p6 }
  0x71   : > { %1402 = shalt.err (!%p1399_p10)
}
  0x72   : > { %s1610_s4 = smov 128   ;;  %s2260_s10 = sld [smem:[#allocation14_spill]] }
  0x73   : > { %s1611_s9 = smov 8   ;;  %s2261_s21 = smov 256  }
  0x74   : > { %1152 = dma.hbm_to_vmem [thread:$0]  (!%p1873_p3), %s1880_s26, 2048, %s1867_s1, %s1882_s3, %s2261_s21, %s1610_s4, %s1611_s9  }
  0x75   : > { %s261_s20 = sadd.s32 %s1595_s28, %s1057_s19  ;;  %s2262_s13 = sld [smem:[#allocation28_spill]] }
  0x76   : > { %s1010_s11 = sshll.u32 %s261_s20, 7  ;;  %s995_s0 = sadd.s32 4294967294, %s1603_s30  }
  0x77   : > { %s133_s25 = sadd.s32 1, %s1551_s17  ;;  %p140_p7 = scmp.ne.s32.totalorder %s1551_s17, %s1547_s16 }
  0x78   : > { %s1928_s8 = scalar_select %p1856_p2, %s1551_s17, %s133_s25  }
  0x79   : > { %p2263_p8 = scmp.eq.s32.totalorder %s1603_s30, 0  ;;  %p146_p3 = scmp.ne.s32.totalorder %s1547_s16, %s2260_s10 }
  0x7a   : > { %p172_p12 = scmp.eq.s32.totalorder %s1723_s5, 15  ;;  %p178_p5 = scmp.eq.s32.totalorder %s995_s0, 15 }
  0x7b   : > { %s1919_s6 = scalar_lea.hbm %s2262_s13, %s1010_s11  ;;  %p142_p6 = por %p140_p7, %p2263_p8 }
  0x7c   : > { %p2264_p9 = scmp.eq.s32.totalorder %s1723_s5, 0  ;;  %s253_s19 = sand.u32 1, %s1551_s17  }
  0x7d   : > { %p1942_p11 = por %p172_p12, %p140_p7  ;;  %p1946_p0 = por %p178_p5, %p146_p3 }
  0x7e   : > { %p1937_p1 = por %p146_p3, %p2264_p9  ;;  %s1007_s14 = sshll.u32 %s253_s19, 7 }
  0x7f   : > { %s2266_s26 = scalar_select %p1942_p11, 1, 0 }
  0x80   : > { %s2267_s25 = scalar_select %p1946_p0, 1, 0 }
  0x81   : > { %p2268_p2 = scmp.lt.s32.totalorder %s1603_s30, 16  ;;  %s255_s3 = scalar_lea.vmem [#allocation8], %s1007_s14 }
  0x82   : > { %s264_s10 = sshll.u32 %s255_s3, 4  ;;  %s1403_s21 = scalar_lea.hbm %s1919_s6, 2048  ;;  %s1956_s10 = int_to_ptr.vmem [resolvable:$true] %s264_s10 }
  0x83   : > { %p1952_p13 = pnand %p2268_p2, %p142_p6  ;;  %p1404_p4 = scmp.ne.s32.totalorder %s1919_s6, %s1403_s21 }
  0x84   : > { %s1408_s12 = scalar_lea.hbm %s2262_s13, 16384  ;;  %p1409_p6 = scmp.lt.u32.totalorder %s1919_s6, %s2262_s13 }
  0x85   : > { %p1405_p10 = pneg %p1952_p13  ;;  %p1410_p3 = scmp.lt.u32.totalorder %s1408_s12, %s1403_s21 }
  0x86   : > { %p1412_p5 = scmp.lt.u32.totalorder %s1403_s21, %s1919_s6 }
  0x87   : > { %p1406_p7 = pnand %p1405_p10, %p1404_p4  ;;  %p1411_p12 = por %p1410_p3, %p1409_p6 }
  0x89   : > { %p1407_p8 = pneg %p1406_p7  ;;  %p1413_p9 = por %p1412_p5, %p1411_p12 }
  0x8b   : > { %p1414_p2 = pnand %p1413_p9, %p1407_p8 }
  0x8d   : > { %1417 = shalt.err (!%p1414_p2)
}
  0x8e   : > { %s1418_s14 = scalar_lea.vmem %s1956_s10, 2048  ;;  %s1612_s3 = smov [#allocation8]  }
  0x8f   : > { %p1419_p4 = scmp.ne.s32.totalorder %s1956_s10, %s1418_s14  ;;  %s1423_s20 = sshll.u32 %s1612_s3, 4  ;;  %s1424_s20 = int_to_ptr.vmem [resolvable:$false] %s1423_s20 }
  0x90   : > { %s1425_s11 = scalar_lea.vmem %s1424_s20, 4096  ;;  %p1426_p11 = scmp.lt.s32.totalorder %s1956_s10, %s1424_s20 }
  0x91   : > { %p1421_p7 = pnand %p1419_p4, %p1405_p10  ;;  %p1427_p6 = scmp.lt.s32.totalorder %s1425_s11, %s1418_s14 }
  0x93   : > { %p1422_p0 = pneg %p1421_p7  ;;  %p1428_p3 = por %p1427_p6, %p1426_p11 }
  0x95   : > { %p1429_p12 = pnand %p1428_p3, %p1422_p0 }
  0x97   : > { %1432 = shalt.err (!%p1429_p12)
}
  0x98   : > { %s1613_s21 = smov 512   ;;  %p2270_p10 = scmp.ne.s32.totalorder %s2249_s24, 0 }
  0x99   : > { %1158 = dma.hbm_to_vmem [thread:$0]  (!%p1952_p13), %s1919_s6, 2048, %s1956_s10, %s1791_s2, %s1613_s21, %s1610_s4, %s1611_s9  }
  0x9a   : > { %276 = sbr.rel (%p2270_p10) target bundleno = 514 (0x202), region = 36  ;;  %s278_s12 = sand.u32 (!%p2270_p10), 1, %s1571_s22  }
  0x9b   : > { %s1012_s18 = sshll.u32 (!%p2270_p10), %s278_s12, 7  ;;  %s279_s19 = scalar_lea.sflag (!%p2270_p10), [#allocation4], %s278_s12 }
  0x9c   : > { %s1989_s14 = scalar_lea.vmem (!%p2270_p10), [#allocation3], %s1012_s18  ;;  %p2271_p11 = scmp.ne.s32.totalorder (!%p2270_p10), %s2255_s7, 0 }
  0xa1   : > { %1526 = dma.done.wait (%p2271_p11), %s279_s19, 2048  }
  0xa2   : > { %1528 = vsyncadd (%p2271_p11), %s279_s19, 4294965248  ;;  %s2272_s0 = sld [smem:[#allocation15_spill]]  ;;  %s2273_s3 = sld [smem:[#allocation22_spill]] }
  0xa3   : > { %s287_s20 = sand.u32 1, %s1723_s5  }
  0xa4   : > { %s288_s24 = scalar_lea.sflag [#allocation7], %s287_s20 }
  0xa8   : > { %s289_s2 = sand.u32 1, %s2272_s0   ;;  %p2274_p0 = scmp.ne.s32.totalorder %s2273_s3, 0 }
  0xa9   : > { %s1013_s4 = sshll.u32 %s289_s2, 7 }
  0xaa   : > { %s1997_s9 = scalar_lea.vmem [#allocation6], %s1013_s4 }
  0xab   : > { %1530 = dma.done.wait (%p2274_p0), %s288_s24, 2048  }
  0xac   : > { %1532 = vsyncadd (%p2274_p0), %s288_s24, 4294965248  ;;  %s298_s6 = sand.u32 1, %s1547_s16  }
  0xad   : > { %s1014_s7 = sshll.u32 %s298_s6, 7 }
  0xae   : > { %s2006_s10 = scalar_lea.vmem [#allocation8], %s1014_s7 }
  0xaf   : > { %1534 = dma.done.wait (%p1937_p1), %s288_s24, 2048  }
  0xb0   : > { %1536 = vsyncadd (%p1937_p1), %s288_s24, 4294965248  ;;  %s2275_s5 = sld [smem:[#allocation18_spill]]  ;;  %s2276_s12 = sld [smem:[#allocation27_spill]] }
  0xb1   : > { %s2020_s19 = scalar_lea.vmem [#allocation9], %s1014_s7  ;;  %s2277_s0 = sld [smem:[#allocation17_spill]] }
  0xb6   : > { %p341_p13 = scmp.lt.s32.totalorder %s2275_s5, 3 }
  0xb7   : > { %p1016_p8 = scmp.ne.s32.totalorder %s2277_s0, 0 }
  0xb8   : > { %s2316_s5 = smov (!%p341_p13, %s2275_s5), 3  ;;  %v1614_v0 = vmov (!%p1016_p8), 0.0  }
  0xb9   : > { %s343_s18 = scalar_lea.vmem %s2276_s12, %s2316_s5  ;;  %350 = sbr.rel (%p1016_p8) target bundleno = 193 (0xc1), region = 52  ;;  %351 = vst [vmem:[#allocation2] sm:$0xff] (!%p1016_p8), %v1614_v0  ;;  %352 = vst [vmem:[#allocation2 + $0x8] sm:$0xff] (!%p1016_p8), %v1614_v0 }
  0xba   : > { %353 = vst [vmem:[#allocation2 + $0x10] sm:$0xff] (!%p1016_p8), %v1614_v0  ;;  %354 = vst [vmem:[#allocation2 + $0x18] sm:$0xff] (!%p1016_p8), %v1614_v0 }
  0xbb   : > { %355 = vst [vmem:[#allocation2 + $0x20] sm:$0xff] (!%p1016_p8), %v1614_v0  ;;  %356 = vst [vmem:[#allocation2 + $0x28] sm:$0xff] (!%p1016_p8), %v1614_v0 }
  0xbc   : > { %357 = vst [vmem:[#allocation2 + $0x30] sm:$0xff] (!%p1016_p8), %v1614_v0  ;;  %358 = vst [vmem:[#allocation2 + $0x38] sm:$0xff] (!%p1016_p8), %v1614_v0 }
  0xbd   : > { %359 = vst [vmem:[#allocation2 + $0x40] sm:$0xff] (!%p1016_p8), %v1614_v0  ;;  %360 = vst [vmem:[#allocation2 + $0x48] sm:$0xff] (!%p1016_p8), %v1614_v0 }
  0xbe   : > { %361 = vst [vmem:[#allocation2 + $0x50] sm:$0xff] (!%p1016_p8), %v1614_v0  ;;  %362 = vst [vmem:[#allocation2 + $0x58] sm:$0xff] (!%p1016_p8), %v1614_v0 }
  0xbf   : > { %363 = vst [vmem:[#allocation2 + $0x60] sm:$0xff] (!%p1016_p8), %v1614_v0  ;;  %364 = vst [vmem:[#allocation2 + $0x68] sm:$0xff] (!%p1016_p8), %v1614_v0 }
  0xc0   : > { %365 = vst [vmem:[#allocation2 + $0x70] sm:$0xff] %v1614_v0  ;;  %366 = vst [vmem:[#allocation2 + $0x78] sm:$0xff] %v1614_v0 }
  0xc1 PF: > { %v1303_v1 = vld [vmem:[%s1997_s9 + $0x40] sm:$0xff]   ;;  %v1305_v3 = vld [vmem:[%s1997_s9 + $0x48] sm:$0xff]   ;;  %v1307_v5 = vld [vmem:[%s1997_s9 + $0x50] sm:$0xff]   ;;  %s2278_s1 = sld [smem:[#allocation17_spill]] }
  0xc2   : > { %v1304_v2 = vld [vmem:[%s1997_s9] sm:$0xff]   ;;  %1061 = vmatprep.subr.bf16.mxu0 %v1303_v1  ;;  %1125 = vmatprep.subr.bf16.mxu1 %v1303_v1  ;;  %v1306_v4 = vld [vmem:[%s1997_s9 + $0x8] sm:$0xff]   ;;  %v1308_v6 = vld [vmem:[%s1997_s9 + $0x10] sm:$0xff]  }
  0xc3   : > { %1062 = vmatpush3.bf16.msra.mxu0 %v1304_v2  ;;  %1133 = vmatpush3.bf16.msra.mxu1 %v1304_v2  ;;  %v1309_v7 = vld [vmem:[%s1997_s9 + $0x58] sm:$0xff]   ;;  %v1311_v9 = vld [vmem:[%s1997_s9 + $0x60] sm:$0xff]   ;;  %v1313_v11 = vld [vmem:[%s1997_s9 + $0x68] sm:$0xff]  }
  0xc4   : > { %1063 = vmatprep.subr.bf16.mxu0 %v1305_v3  ;;  %1126 = vmatprep.subr.bf16.mxu1 %v1305_v3  ;;  %v1310_v8 = vld [vmem:[%s1997_s9 + $0x18] sm:$0xff]   ;;  %v1312_v10 = vld [vmem:[%s1997_s9 + $0x20] sm:$0xff]   ;;  %v1314_v14 = vld [vmem:[%s1997_s9 + $0x28] sm:$0xff]  }
  0xc5   : > { %v1321_v12 = vld [vmem:[%s1989_s14 + $0x4] ss:$8 sps:$4 sm:$0xff]   ;;  %v1315_v15 = vld [vmem:[%s1997_s9 + $0x70] sm:$0xff]   ;;  %v1317_v17 = vld [vmem:[%s1997_s9 + $0x78] sm:$0xff]  }
  0xc6   : > { %v1324_v13 = vld [vmem:[%s1989_s14 + $0x44] ss:$8 sps:$4 sm:$0xff]   ;;  %639 = vmatprep.mubr.bf16.mxu0 %v1321_v12  ;;  %v1316_v16 = vld [vmem:[%s1997_s9 + $0x30] sm:$0xff]   ;;  %v1318_v18 = vld [vmem:[%s1997_s9 + $0x38] sm:$0xff]  }
  0xc7   : > { %1064 = vmatpush3.bf16.msra.mxu0 %v1306_v4  ;;  %1134 = vmatpush3.bf16.msra.mxu1 %v1306_v4  ;;  %v1319_v19 = vld [vmem:[%s1989_s14] ss:$8 sps:$4 sm:$0xff]   ;;  %v1325_v21 = vld [vmem:[%s1989_s14 + $0x14] ss:$8 sps:$4 sm:$0xff]   ;;  %v1329_v23 = vld [vmem:[%s1989_s14 + $0x10] ss:$8 sps:$4 sm:$0xff]  }
  0xc8   : > { %1065 = vmatprep.subr.bf16.mxu0 %v1307_v5  ;;  %1127 = vmatprep.subr.bf16.mxu1 %v1307_v5  ;;  %v1322_v20 = vld [vmem:[%s1989_s14 + $0x40] ss:$8 sps:$4 sm:$0xff]   ;;  %v1327_v22 = vld [vmem:[%s1989_s14 + $0x54] ss:$8 sps:$4 sm:$0xff]   ;;  %v1330_v24 = vld [vmem:[%s1989_s14 + $0x50] ss:$8 sps:$4 sm:$0xff]  }
  0xc9   : > { %671 = vmatprep.mubr.bf16.mxu1 %v1324_v13  ;;  %v1331_v25 = vld [vmem:[%s1989_s14 + $0x24] ss:$8 sps:$4 sm:$0xff]   ;;  %v1335_v27 = vld [vmem:[%s1989_s14 + $0x20] ss:$8 sps:$4 sm:$0xff]   ;;  %v1337_v29 = vld [vmem:[%s1989_s14 + $0x34] ss:$8 sps:$4 sm:$0xff]  }
  0xca   : > { %v1333_v26 = vld [vmem:[%s1989_s14 + $0x64] ss:$8 sps:$4 sm:$0xff]   ;;  %v1336_v28 = vld [vmem:[%s1989_s14 + $0x60] ss:$8 sps:$4 sm:$0xff]   ;;  %v1339_v30 = vld [vmem:[%s1989_s14 + $0x74] ss:$8 sps:$4 sm:$0xff]  }
  0xcb   : > { %1066 = vmatpush3.bf16.msra.mxu0 %v1308_v6  ;;  %1135 = vmatpush3.bf16.msra.mxu1 %v1308_v6  ;;  %v1341_v31 = vld [vmem:[%s1989_s14 + $0x30] ss:$8 sps:$4 sm:$0xff]   ;;  %v367_v35 = vld [vmem:[#allocation2] sm:$0xff]  ;;  %v368_v43 = vld [vmem:[#allocation2 + $0x8] sm:$0xff]  ;;  %p1049_p1 = scmp.ne.s32.totalorder %s2278_s1, 1 }
  0xcc   : > { %1067 = vmatprep.subr.bf16.mxu0 %v1309_v7  ;;  %1128 = vmatprep.subr.bf16.mxu1 %v1309_v7  ;;  %v1342_v32 = vld [vmem:[%s1989_s14 + $0x70] ss:$8 sps:$4 sm:$0xff]   ;;  %v375_v37 = vld [vmem:[#allocation2 + $0x40] sm:$0xff]  ;;  %v376_v45 = vld [vmem:[#allocation2 + $0x48] sm:$0xff] }
  0xcd   : > { %v369_v55 = vld [vmem:[#allocation2 + $0x10] sm:$0xff]  ;;  %v370_v63 = vld [vmem:[#allocation2 + $0x18] sm:$0xff]  ;;  %v379_v13 = vld [vmem:[#allocation2 + $0x60] sm:$0xff] }
  0xce   : > { %v377_v57 = vld [vmem:[#allocation2 + $0x50] sm:$0xff]  ;;  %v378_v1 = vld [vmem:[#allocation2 + $0x58] sm:$0xff] }
  0xcf   : > { %1068 = vmatpush3.bf16.msra.mxu0 %v1310_v8  ;;  %1136 = vmatpush3.bf16.msra.mxu1 %v1310_v8 }
  0xd0   : > { %1069 = vmatprep.subr.bf16.mxu0 %v1311_v9  ;;  %1129 = vmatprep.subr.bf16.mxu1 %v1311_v9 }
  0xd3   : > { %1070 = vmatpush3.bf16.msra.mxu0 %v1312_v10  ;;  %1137 = vmatpush3.bf16.msra.mxu1 %v1312_v10 }
  0xd4   : > { %1071 = vmatprep.subr.bf16.mxu0 %v1313_v11  ;;  %1130 = vmatprep.subr.bf16.mxu1 %v1313_v11  ;;  %v371_v11 = vld [vmem:[#allocation2 + $0x20] sm:$0xff] }
  0xd7   : > { %1072 = vmatpush3.bf16.msra.mxu0 %v1314_v14  ;;  %1138 = vmatpush3.bf16.msra.mxu1 %v1314_v14 }
  0xd8   : > { %1073 = vmatprep.subr.bf16.mxu0 %v1315_v15  ;;  %1131 = vmatprep.subr.bf16.mxu1 %v1315_v15 }
  0xdb   : > { %1074 = vmatpush3.bf16.msra.mxu0 %v1316_v16  ;;  %1139 = vmatpush3.bf16.msra.mxu1 %v1316_v16 }
  0xdc   : > { %1075 = vmatprep.subr.bf16.mxu0 %v1317_v17  ;;  %1132 = vmatprep.subr.bf16.mxu1 %v1317_v17 }
  0xdf   : > { %1076 = vmatpush3.bf16.msra.mxu0 %v1318_v18  ;;  %1140 = vmatpush3.bf16.msra.mxu1 %v1318_v18 }
  0xe2   : > { %640 = vmatmul.mubr.bf16.vlgmr.msra.gmra.mrb[0].mxu0 %v1319_v19  ;;  %672 = vmatmul.mubr.bf16.vlgmr.msra.gmra.mrb[0].mxu1 %v1322_v20  ;;  %v372_v19 = vld [vmem:[#allocation2 + $0x28] sm:$0xff] }
  0xe3   : > { %647 = vmatprep.mubr.bf16.mxu0 %v1325_v21  ;;  %679 = vmatprep.mubr.bf16.mxu1 %v1327_v22  ;;  %v380_v21 = vld [vmem:[#allocation2 + $0x68] sm:$0xff] }
  0xea   : > { %648 = vmatmul.mubr.bf16.gmra.mrb[4].mxu0 %v1329_v23  ;;  %680 = vmatmul.mubr.bf16.gmra.mrb[4].mxu1 %v1330_v24 }
  0xeb   : > { %655 = vmatprep.mubr.bf16.mxu0 %v1331_v25  ;;  %687 = vmatprep.mubr.bf16.mxu1 %v1333_v26 }
  0xf2   : > { %656 = vmatmul.mubr.bf16.gmra.mrb[8].mxu0 %v1335_v27  ;;  %688 = vmatmul.mubr.bf16.gmra.mrb[8].mxu1 %v1336_v28 }
  0xf3   : > { %663 = vmatprep.mubr.bf16.mxu0 %v1337_v29  ;;  %695 = vmatprep.mubr.bf16.mxu1 %v1339_v30 }
  0xfa   : > { %664 = vmatmul.mubr.bf16.gmra.mrb[12].mxu0 %v1341_v31  ;;  %696 = vmatmul.mubr.bf16.gmra.mrb[12].mxu1 %v1342_v32  ;;  %v373_v31 = vld [vmem:[#allocation2 + $0x30] sm:$0xff] }
 0x1b5   : > { %v1077_v33 = vpop.f32.mrb[0].mxu0  ;;  %v1101_v34 = vpop.f32.mrb[0].mxu1 }
 0x1b6   : > { %v1078_v36 = vpop.f32.mrb[1].mxu0  ;;  %v1102_v38 = vpop.f32.mrb[1].mxu1 }
 0x1b7   : > { %v1079_v39 = vadd.f32 %v1078_v36, %v1077_v33  ;;  %v1103_v40 = vadd.f32 %v1102_v38, %v1101_v34  ;;  %v1080_v41 = vpop.f32.mrb[2].mxu0  ;;  %v1104_v42 = vpop.f32.mrb[2].mxu1  ;;  %v381_v33 = vld [vmem:[#allocation2 + $0x70] sm:$0xff] }
 0x1b8   : > { %v1081_v44 = vpop.f32.mrb[3].mxu0  ;;  %v1105_v46 = vpop.f32.mrb[3].mxu1 }
 0x1b9   : > { %v704_v47 = vadd.f32 %v1079_v39, %v367_v35  ;;  %v712_v48 = vadd.f32 %v1103_v40, %v375_v37  ;;  %v1082_v49 = vadd.f32 %v1081_v44, %v1080_v41  ;;  %v1106_v50 = vadd.f32 %v1105_v46, %v1104_v42  ;;  %v374_v39 = vld [vmem:[#allocation2 + $0x38] sm:$0xff] }
 0x1ba   : > { %v382_v41 = vld [vmem:[#allocation2 + $0x78] sm:$0xff] }
 0x1bb   : > { %720 = vst [vmem:[#allocation2] sm:$0xff] %v704_v47  ;;  %728 = vst [vmem:[#allocation2 + $0x40] sm:$0xff] %v712_v48  ;;  %v705_v51 = vadd.f32 %v1082_v49, %v368_v43  ;;  %v713_v52 = vadd.f32 %v1106_v50, %v376_v45  ;;  %v2061_v50 = vld [vmem:[%s343_s18] ss:$0 sm:$0xff] (!%p1049_p1) }
 0x1bd   : > { %721 = vst [vmem:[#allocation2 + $0x8] sm:$0xff] %v705_v51  ;;  %729 = vst [vmem:[#allocation2 + $0x48] sm:$0xff] %v713_v52  ;;  %v1083_v53 = vpop.f32.mrb[4].mxu0  ;;  %v1107_v54 = vpop.f32.mrb[4].mxu1  ;;  %v779_v51 = vld [vmem:[%s2006_s10] sm:$0xff] (!%p1049_p1) }
 0x1be   : > { %v1084_v56 = vpop.f32.mrb[5].mxu0  ;;  %v1108_v58 = vpop.f32.mrb[5].mxu1 }
 0x1bf   : > { %v1085_v59 = vadd.f32 %v1084_v56, %v1083_v53  ;;  %v1109_v60 = vadd.f32 %v1108_v58, %v1107_v54  ;;  %v1086_v61 = vpop.f32.mrb[6].mxu0  ;;  %v1110_v62 = vpop.f32.mrb[6].mxu1  ;;  %v780_v54 = vld [vmem:[%s2006_s10 + $0x8] sm:$0xff] (!%p1049_p1)  ;;  %v781_v58 = vld [vmem:[%s2006_s10 + $0x10] sm:$0xff] (!%p1049_p1) }
 0x1c0   : > { %v1087_v0 = vpop.f32.mrb[7].mxu0  ;;  %v1111_v2 = vpop.f32.mrb[7].mxu1 }
 0x1c1   : > { %v706_v3 = vadd.f32 %v1085_v59, %v369_v55  ;;  %v714_v4 = vadd.f32 %v1109_v60, %v377_v57  ;;  %v1088_v5 = vadd.f32 %v1087_v0, %v1086_v61  ;;  %v1112_v6 = vadd.f32 %v1111_v2, %v1110_v62  ;;  %v782_v60 = vld [vmem:[%s2006_s10 + $0x18] sm:$0xff] (!%p1049_p1)  ;;  %v783_v0 = vld [vmem:[%s2006_s10 + $0x20] sm:$0xff] (!%p1049_p1) }
 0x1c2   : > { %v740_v49 = vld [vmem:[#allocation2] sm:$0xff] (!%p1049_p1) }
 0x1c3   : > { %722 = vst [vmem:[#allocation2 + $0x10] sm:$0xff] %v706_v3  ;;  %730 = vst [vmem:[#allocation2 + $0x50] sm:$0xff] %v714_v4  ;;  %v707_v7 = vadd.f32 %v1088_v5, %v370_v63  ;;  %v715_v8 = vadd.f32 %v1112_v6, %v378_v1  ;;  %v763_v52 = vadd.f32 (!%p1049_p1), %v2061_v50, %v740_v49  ;;  %v784_v6 = vld [vmem:[%s2006_s10 + $0x28] sm:$0xff] (!%p1049_p1) }
 0x1c4   : > { %v741_v53 = vld [vmem:[#allocation2 + $0x8] sm:$0xff] (!%p1049_p1) }
 0x1c5   : > { %723 = vst [vmem:[#allocation2 + $0x18] sm:$0xff] %v707_v7  ;;  %731 = vst [vmem:[#allocation2 + $0x58] sm:$0xff] %v715_v8  ;;  %v1089_v9 = vpop.f32.mrb[8].mxu0  ;;  %v1113_v10 = vpop.f32.mrb[8].mxu1  ;;  %v764_v56 = vadd.f32 (!%p1049_p1), %v2061_v50, %v741_v53  ;;  %v795_v61 = vadd.f32 (!%p1049_p1), %v779_v51, %v763_v52  ;;  %v785_v8 = vld [vmem:[%s2006_s10 + $0x30] sm:$0xff] (!%p1049_p1) }
 0x1c6   : > { %v1090_v12 = vpop.f32.mrb[9].mxu0  ;;  %v1114_v14 = vpop.f32.mrb[9].mxu1 }
 0x1c7   : > { %v1091_v15 = vadd.f32 %v1090_v12, %v1089_v9  ;;  %v1115_v16 = vadd.f32 %v1114_v14, %v1113_v10  ;;  %v1092_v17 = vpop.f32.mrb[10].mxu0  ;;  %v1116_v18 = vpop.f32.mrb[10].mxu1  ;;  %v796_v2 = vadd.f32 (!%p1049_p1), %v780_v54, %v764_v56  ;;  %811 = vst [vmem:[%s2020_s19] sm:$0xff] (!%p1049_p1), %v795_v61  ;;  %v786_v12 = vld [vmem:[%s2006_s10 + $0x38] sm:$0xff] (!%p1049_p1) }
 0x1c8   : > { %v1093_v20 = vpop.f32.mrb[11].mxu0  ;;  %v1117_v22 = vpop.f32.mrb[11].mxu1 }
 0x1c9   : > { %v708_v23 = vadd.f32 %v1091_v15, %v371_v11  ;;  %v716_v24 = vadd.f32 %v1115_v16, %v379_v13  ;;  %v1094_v25 = vadd.f32 %v1093_v20, %v1092_v17  ;;  %v1118_v26 = vadd.f32 %v1117_v22, %v1116_v18  ;;  %v748_v13 = vld [vmem:[#allocation2 + $0x40] sm:$0xff] (!%p1049_p1)  ;;  %812 = vst [vmem:[%s2020_s19 + $0x8] sm:$0xff] (!%p1049_p1), %v796_v2  ;;  %v788_v20 = vld [vmem:[%s2006_s10 + $0x48] sm:$0xff] (!%p1049_p1) }
 0x1ca   : > { %v742_v55 = vld [vmem:[#allocation2 + $0x10] sm:$0xff] (!%p1049_p1)  ;;  %v771_v17 = vadd.f32 (!%p1049_p1), %v2061_v50, %v748_v13  ;;  %v787_v18 = vld [vmem:[%s2006_s10 + $0x40] sm:$0xff] (!%p1049_p1) }
 0x1cb   : > { %724 = vst [vmem:[#allocation2 + $0x20] sm:$0xff] %v708_v23  ;;  %732 = vst [vmem:[#allocation2 + $0x60] sm:$0xff] %v716_v24  ;;  %v709_v27 = vadd.f32 %v1094_v25, %v372_v19  ;;  %v717_v28 = vadd.f32 %v1118_v26, %v380_v21  ;;  %v765_v57 = vadd.f32 (!%p1049_p1), %v2061_v50, %v742_v55  ;;  %v749_v19 = vld [vmem:[#allocation2 + $0x48] sm:$0xff] (!%p1049_p1)  ;;  %v750_v23 = vld [vmem:[#allocation2 + $0x50] sm:$0xff] (!%p1049_p1) }
 0x1cc   : > { %v743_v59 = vld [vmem:[#allocation2 + $0x18] sm:$0xff] (!%p1049_p1)  ;;  %v772_v22 = vadd.f32 (!%p1049_p1), %v2061_v50, %v749_v19  ;;  %v789_v24 = vld [vmem:[%s2006_s10 + $0x50] sm:$0xff] (!%p1049_p1) }
 0x1cd   : > { %725 = vst [vmem:[#allocation2 + $0x28] sm:$0xff] %v709_v27  ;;  %733 = vst [vmem:[#allocation2 + $0x68] sm:$0xff] %v717_v28  ;;  %v1095_v29 = vpop.f32.mrb[12].mxu0  ;;  %v1119_v30 = vpop.f32.mrb[12].mxu1  ;;  %v766_v62 = vadd.f32 (!%p1049_p1), %v2061_v50, %v743_v59  ;;  %v797_v3 = vadd.f32 (!%p1049_p1), %v781_v58, %v765_v57  ;;  %v751_v25 = vld [vmem:[#allocation2 + $0x58] sm:$0xff] (!%p1049_p1)  ;;  %v803_v27 = vadd.f32 (!%p1049_p1), %v787_v18, %v771_v17 }
 0x1ce   : > { %v1096_v32 = vpop.f32.mrb[13].mxu0  ;;  %v1120_v34 = vpop.f32.mrb[13].mxu1  ;;  %v773_v28 = vadd.f32 (!%p1049_p1), %v2061_v50, %v750_v23 }
 0x1cf   : > { %v1097_v35 = vadd.f32 %v1096_v32, %v1095_v29  ;;  %v1121_v36 = vadd.f32 %v1120_v34, %v1119_v30  ;;  %v1098_v37 = vpop.f32.mrb[14].mxu0  ;;  %v1122_v38 = vpop.f32.mrb[14].mxu1  ;;  %739 = sbr.rel (%p1049_p1) target bundleno = 483 (0x1e3), region = 56  ;;  %v798_v9 = vadd.f32 (!%p1049_p1), %v782_v60, %v766_v62  ;;  %813 = vst [vmem:[%s2020_s19 + $0x10] sm:$0xff] (!%p1049_p1), %v797_v3  ;;  %v774_v29 = vadd.f32 (!%p1049_p1), %v2061_v50, %v751_v25  ;;  %v790_v30 = vld [vmem:[%s2006_s10 + $0x58] sm:$0xff] (!%p1049_p1)  ;;  %v791_v32 = vld [vmem:[%s2006_s10 + $0x60] sm:$0xff] (!%p1049_p1) }
 0x1d0   : > { %v1099_v40 = vpop.f32.mrb[15].mxu0  ;;  %v1123_v42 = vpop.f32.mrb[15].mxu1  ;;  %819 = vst [vmem:[%s2020_s19 + $0x40] sm:$0xff] (!%p1049_p1), %v803_v27 }
 0x1d1   : > { %v710_v43 = vadd.f32 %v1097_v35, %v373_v31  ;;  %v718_v44 = vadd.f32 %v1121_v36, %v381_v33  ;;  %v1100_v45 = vadd.f32 %v1099_v40, %v1098_v37  ;;  %v1124_v46 = vadd.f32 %v1123_v42, %v1122_v38  ;;  %814 = vst [vmem:[%s2020_s19 + $0x18] sm:$0xff] (!%p1049_p1), %v798_v9  ;;  %v792_v36 = vld [vmem:[%s2006_s10 + $0x68] sm:$0xff] (!%p1049_p1)  ;;  %v793_v42 = vld [vmem:[%s2006_s10 + $0x70] sm:$0xff] (!%p1049_p1) }
 0x1d2   : > { %v744_v63 = vld [vmem:[#allocation2 + $0x20] sm:$0xff] (!%p1049_p1)  ;;  %v804_v33 = vadd.f32 (!%p1049_p1), %v788_v20, %v772_v22  ;;  %v805_v38 = vadd.f32 (!%p1049_p1), %v789_v24, %v773_v28 }
 0x1d3   : > { %726 = vst [vmem:[#allocation2 + $0x30] sm:$0xff] %v710_v43  ;;  %734 = vst [vmem:[#allocation2 + $0x70] sm:$0xff] %v718_v44  ;;  %v711_v47 = vadd.f32 %v1100_v45, %v374_v39  ;;  %v719_v48 = vadd.f32 %v1124_v46, %v382_v41  ;;  %v767_v4 = vadd.f32 (!%p1049_p1), %v2061_v50, %v744_v63  ;;  %v752_v31 = vld [vmem:[#allocation2 + $0x60] sm:$0xff] (!%p1049_p1)  ;;  %v794_v44 = vld [vmem:[%s2006_s10 + $0x78] sm:$0xff] (!%p1049_p1) }
 0x1d4   : > { %v745_v1 = vld [vmem:[#allocation2 + $0x28] sm:$0xff] (!%p1049_p1)  ;;  %v775_v34 = vadd.f32 (!%p1049_p1), %v2061_v50, %v752_v31  ;;  %v806_v39 = vadd.f32 (!%p1049_p1), %v790_v30, %v774_v29  ;;  %820 = vst [vmem:[%s2020_s19 + $0x48] sm:$0xff] (!%p1049_p1), %v804_v33  ;;  %821 = vst [vmem:[%s2020_s19 + $0x50] sm:$0xff] (!%p1049_p1), %v805_v38 }
 0x1d5   : > { %727 = vst [vmem:[#allocation2 + $0x38] sm:$0xff] %v711_v47  ;;  %735 = vst [vmem:[#allocation2 + $0x78] sm:$0xff] %v719_v48  ;;  %v768_v5 = vadd.f32 (!%p1049_p1), %v2061_v50, %v745_v1  ;;  %v799_v14 = vadd.f32 (!%p1049_p1), %v783_v0, %v767_v4  ;;  %v753_v35 = vld [vmem:[#allocation2 + $0x68] sm:$0xff] (!%p1049_p1) }
 0x1d6   : > { %v776_v40 = vadd.f32 %v2061_v50, %v753_v35  ;;  %v807_v45 = vadd.f32 %v791_v32, %v775_v34  ;;  %822 = vst [vmem:[%s2020_s19 + $0x58] sm:$0xff] %v806_v39 }
 0x1d7   : > { %v800_v15 = vadd.f32 %v784_v6, %v768_v5  ;;  %815 = vst [vmem:[%s2020_s19 + $0x20] sm:$0xff] %v799_v14 }
 0x1d8   : > { %v808_v47 = vadd.f32 %v792_v36, %v776_v40  ;;  %823 = vst [vmem:[%s2020_s19 + $0x60] sm:$0xff] %v807_v45 }
 0x1d9   : > { %816 = vst [vmem:[%s2020_s19 + $0x28] sm:$0xff] %v800_v15 }
 0x1da   : > { %v746_v7 = vld [vmem:[#allocation2 + $0x30] sm:$0xff]  ;;  %824 = vst [vmem:[%s2020_s19 + $0x68] sm:$0xff] %v808_v47 }
 0x1db   : > { %v769_v10 = vadd.f32 %v2061_v50, %v746_v7  ;;  %v754_v37 = vld [vmem:[#allocation2 + $0x70] sm:$0xff] }
 0x1dc   : > { %v747_v11 = vld [vmem:[#allocation2 + $0x38] sm:$0xff]  ;;  %v777_v41 = vadd.f32 %v2061_v50, %v754_v37 }
 0x1dd   : > { %v770_v16 = vadd.f32 %v2061_v50, %v747_v11  ;;  %v801_v21 = vadd.f32 %v785_v8, %v769_v10  ;;  %v755_v43 = vld [vmem:[#allocation2 + $0x78] sm:$0xff] }
 0x1de   : > { %v778_v46 = vadd.f32 %v2061_v50, %v755_v43  ;;  %v809_v48 = vadd.f32 %v793_v42, %v777_v41 }
 0x1df   : > { %v802_v26 = vadd.f32 %v786_v12, %v770_v16  ;;  %817 = vst [vmem:[%s2020_s19 + $0x30] sm:$0xff] %v801_v21 }
 0x1e0   : > { %v810_v49 = vadd.f32 %v794_v44, %v778_v46  ;;  %825 = vst [vmem:[%s2020_s19 + $0x70] sm:$0xff] %v809_v48 }
 0x1e1   : > { %818 = vst [vmem:[%s2020_s19 + $0x38] sm:$0xff] %v802_v26 }
 0x1e2   : > { %826 = vst [vmem:[%s2020_s19 + $0x78] sm:$0xff] %v810_v49 }
 0x1e3 PF: > { %s2280_s2 = sld [smem:[#allocation19_spill]]  ;;  %s2281_s4 = sld [smem:[#allocation18_spill]] }
 0x1e4   : > { %s843_s7 = sshll.u32 %s2020_s19, 4  ;;  %s2282_s21 = sld [smem:[#allocation29_spill]]  ;;  %s2114_s7 = int_to_ptr.vmem [resolvable:$true] %s843_s7 }
 0x1e5   : > { %s2123_s0 = scalar_lea.sflag [#allocation5], %s298_s6  ;;  %s1433_s1 = scalar_lea.vmem %s2114_s7, 2048 }
 0x1e6   : > { %p1434_p5 = scmp.ne.s32.totalorder %s2114_s7, %s1433_s1  ;;  %p2284_p9 = scmp.ne.s32.totalorder %s2266_s26, 0 }
 0x1e7   : > { %s1615_s19 = smov [#allocation9]  }
 0x1e8   : > { %p1435_p2 = pnand %p1434_p5, %p2284_p9  ;;  %s1437_s14 = sshll.u32 %s1615_s19, 4  ;;  %s1438_s14 = int_to_ptr.vmem [resolvable:$false] %s1437_s14 }
 0x1e9   : > { %s1060_s24 = sshll.u32 %s2280_s2, 6  ;;  %s1439_s3 = scalar_lea.vmem %s1438_s14, 4096 }
 0x1ea   : > { %s840_s9 = sadd.s32 %s2281_s4, %s1060_s24  ;;  %s2283_s12 = smov %s2282_s21 }
 0x1eb   : > { %s1054_s10 = sshll.u32 %s840_s9, 7  ;;  %p1436_p4 = pneg %p1435_p2 }
 0x1ec   : > { %s2119_s18 = scalar_lea.hbm %s2282_s21, %s1054_s10  ;;  %p1440_p7 = scmp.lt.s32.totalorder %s2114_s7, %s1438_s14 }
 0x1ed   : > { %p1441_p6 = scmp.lt.s32.totalorder %s1439_s3, %s1433_s1 }
 0x1ef   : > { %p1442_p3 = por %p1441_p6, %p1440_p7 }
 0x1f1   : > { %p1443_p12 = pnand %p1442_p3, %p1436_p4 }
 0x1f3   : > { %1446 = shalt.err (!%p1443_p12)
}
 0x1f4   : > { %s1447_s6 = scalar_lea.hbm %s2119_s18, 2048  ;;  %s1451_s4 = scalar_lea.hbm %s2283_s12, 16384 }
 0x1f5   : > { %p1448_p10 = scmp.ne.s32.totalorder %s2119_s18, %s1447_s6  ;;  %p1452_p13 = scmp.lt.u32.totalorder %s2119_s18, %s2283_s12 }
 0x1f6   : > { %p1453_p8 = scmp.lt.u32.totalorder %s1451_s4, %s1447_s6  ;;  %p1455_p5 = scmp.lt.u32.totalorder %s1447_s6, %s2119_s18 }
 0x1f7   : > { %p1449_p11 = pnand %p1448_p10, %p2284_p9 }
 0x1f8   : > { %p1454_p1 = por %p1453_p8, %p1452_p13 }
 0x1f9   : > { %p1450_p0 = pneg %p1449_p11 }
 0x1fa   : > { %p1456_p2 = por %p1455_p5, %p1454_p1 }
 0x1fc   : > { %p1457_p4 = pnand %p1456_p2, %p1450_p0 }
 0x1fe   : > { %1460 = shalt.err (!%p1457_p4)
}
 0x1ff   : > { %s1616_s10 = smov 128   ;;  %s1617_s5 = smov 512  }
 0x200   : > { %s1618_s11 = smov 8  }
 0x201   : > { %1147 = dma.vmem_to_hbm [thread:$0]  (%p2284_p9), %s2114_s7, 2048, %s2119_s18, %s2123_s0, %s1616_s10, %s1617_s5, %s1618_s11  }
 0x202 PF: > { %s2285_s21 = sld [smem:[#allocation14_spill]]  ;;  %p1164_p7 = scmp.ge.s32.totalorder %s1603_s30, 2 }
 0x203   : > { %p2286_p6 = scmp.ne.s32.totalorder %s2267_s25, 0 }
 0x205   : > { %p1160_p3 = pnand %p1164_p7, %p2286_p6 }
 0x208   : > { %s858_s1 = sand.u32 1, %s2285_s21  }
 0x209   : > { %s859_s19 = scalar_lea.sflag [#allocation5], %s858_s1 }
 0x20a   : > { %1538 = dma.done.wait (!%p1160_p3), %s859_s19, 2048  }
 0x20b   : > { %1540 = vsyncadd (!%p1160_p3), %s859_s19, 4294965248  ;;  %s23_s30 = sadd.s32 1, %s1603_s30   ;;  %s2288_s18 = sld [smem:[#allocation15_spill]] }
 0x20c   : > { %p2152_p12 = scmp.ge.s32.totalorder %s23_s30, 18   ;;  %s2289_s19 = sld [smem:[#allocation16_spill]] }
 0x20d   : > { %s2290_s20 = sld [smem:[#allocation23_spill]]  ;;  %s2291_s26 = smov %s1862_s15 }
 0x20e   : > { %s2292_s7 = sld [smem:[#allocation20_spill]]  ;;  %s2293_s0 = sld [smem:[#allocation21_spill]] }
 0x20f   : > { %s2294_s3 = sld [smem:[#allocation24_spill]]  ;;  %s2295_s15 = smov %s1547_s16 }
 0x210   : > { %s2296_s16 = smov %s1551_s17  ;;  %s2297_s17 = smov %s1928_s8 }
 0x211   : > { %s2298_s21 = smov %s1571_s22  ;;  %s2299_s22 = smov %s1575_s23 }
 0x212   : > { %s2300_s23 = smov %s2291_s26  ;;  %s2301_s24 = smov %s1591_s27 }
 0x213   : > { %s2302_s25 = smov %s1595_s28  ;;  %s2303_s26 = smov %s1599_s29 }
 0x214   : > { %s2304_s27 = smov %s2292_s7  ;;  %s2305_s28 = smov %s2293_s0 }
 0x215   : > { %s2306_s29 = smov %s2294_s3  ;;  %22 = sbr.rel (!%p2152_p12) target bundleno = 19 (0x13), region = 116 }
 0x21c   :  { %864 = vsyncpa [#allocation4], 1 }
 0x21d   :  { %866 = vsyncpa [#allocation4 + $0x1], 1 }
 0x21e   :  { %867 = vsyncpa [#allocation7], 1 }
 0x21f   :  { %869 = vsyncpa [#allocation7 + $0x1], 1 }
 0x220   :  { %870 = vsyncpa [#allocation5], 1 }
 0x221   :  { %872 = vsyncpa [#allocation5 + $0x1], 1 }

</bundles_post_ra>
